<compile_context>
chip_gen: v6e
topology: v6e:2x2x1
jax: 0.10.0
libtpu: 0.0.40
codegen_flags: <defaults>
</compile_context>

<pallas_src>
import numpy as np
import jax
import jax.numpy as jnp
from jax.experimental import pallas as pl
from jax.experimental.pallas import tpu as pltpu


def _cdiv(a, b):
    return -(-a // b)


# ---------------------------------------------------------------------------
# Haar constants
# ---------------------------------------------------------------------------
def make_haar_weights(channel_in: int):
    """Full (4*C, 1, 2, 2) grouped-conv weights (used by the reference only)."""
    hw = np.ones((4, 1, 2, 2), dtype=np.float32)
    hw[1, 0, 0, 1] = -1.0
    hw[1, 0, 1, 1] = -1.0
    hw[2, 0, 1, 0] = -1.0
    hw[2, 0, 1, 1] = -1.0
    hw[3, 0, 1, 0] = -1.0
    hw[3, 0, 0, 1] = -1.0
    return jnp.asarray(np.concatenate([hw] * channel_in, axis=0))


def _merged_combine_mat(kc: int):
    """(kc, kc) merged matrix M = [Msum | Mdiff], 1/4 scale baked in.

    (v @ M)[:, :kc//2] = 0.25 * (v[2j] + v[2j+1])
    (v @ M)[:, kc//2:] = 0.25 * (v[2j] - v[2j+1])
    """
    kh = kc // 2
    m = np.zeros((kc, kc), dtype=np.float32)
    j = np.arange(kh)
    m[2 * j, j] = 0.25
    m[2 * j + 1, j] = 0.25
    m[2 * j, kh + j] = 0.25
    m[2 * j + 1, kh + j] = -0.25
    return jnp.asarray(m)


# ---------------------------------------------------------------------------
# Tile pickers
# ---------------------------------------------------------------------------
def _pick_kc(W: int) -> int:
    """Matmul column-chunk size: full W if small, else largest even divisor <= 256."""
    if W <= 256:
        return W
    kc = 256
    while kc >= 2:
        if W % kc == 0:
            return kc
        kc -= 2
    return W  # unreachable for even W


def _pick_tr(R: int, W: int, N: int, target_block_bytes: int = 4 << 20) -> int:
    """Rows per block: ~target_block_bytes of input, multiple of 8 (or full R)."""
    row_bytes = 2 * W * 4
    tr = max(8, (target_block_bytes // row_bytes) // 8 * 8)
    if tr >= R:
        tr = R                      # full axis: always a legal block dim
    # Keep enough grid steps for megacore sharding / pipelining on small inputs.
    while tr > 8 and N * _cdiv(R, tr) < 8:
        tr = max(8, (tr // 2) // 8 * 8)
    return tr


# ---------------------------------------------------------------------------
# Fused kernel: contiguous (TR, 2W) rows in, four Haar subbands out
# ---------------------------------------------------------------------------
def _haar_fused_kernel(m_ref, x_ref, o_ref):
    # m_ref: (KC, KC)   merged column-combine matrix [Msum | Mdiff]
    # x_ref: (TR, 2W)   lane axis holds [top row | bottom row] of each pair
    # o_ref: (4, TR, Wh) the four Haar subbands (torch filter order)
    two_w = x_ref.shape[-1]
    W = two_w // 2
    kc = m_ref.shape[0]
    kch = kc // 2

    top = x_ref[:, :W]
    bot = x_ref[:, W:]
    rs = top + bot                  # row-pair sum   (VPU)
    rd = top - bot                  # row-pair diff  (VPU)
    m = m_ref[...]

    # Column-pair combine + lane compaction on the MXU, K chunked at kc cols.
    for k in range(W // kc):
        s0 = k * kc
        d0 = k * kch
        ys = jnp.dot(rs[:, s0:s0 + kc], m, preferred_element_type=jnp.float32)
        yd = jnp.dot(rd[:, s0:s0 + kc], m, preferred_element_type=jnp.float32)
        o_ref[0, :, d0:d0 + kch] = ys[:, :kch]
        o_ref[1, :, d0:d0 + kch] = ys[:, kch:]
        o_ref[2, :, d0:d0 + kch] = yd[:, :kch]
        o_ref[3, :, d0:d0 + kch] = yd[:, kch:]


def _haar_fused(x):
    N, C, H, W = x.shape
    assert H % 2 == 0 and W % 2 == 0, "HaarDownsampling needs even H and W"
    Hh, Wh = H // 2, W // 2
    R = C * Hh                              # merged (channel, output-row) axis

    kc = _pick_kc(W)
    tr = _pick_tr(R, W, N)
    m = _merged_combine_mat(kc)

    xv = x.reshape(N, R, 2 * W)             # free reshape (row pairs on lanes)

    grid = (N, _cdiv(R, tr))

    in_blk = tr * 2 * W * 4
    out_blk = 4 * tr * Wh * 4               # == in_blk
    const_b = kc * kc * 4
    vmem_need = 2 * (in_blk + out_blk) + 2 * const_b + (8 << 20)
    vmem_limit = int(min(max(vmem_need, 24 << 20), 40 << 20))

    flops = 4 * N * R * W * kc + 2 * N * R * W
    bytes_accessed = 8 * N * C * H * W + const_b

    out5 = pl.pallas_call(
        _haar_fused_kernel,
        out_shape=jax.ShapeDtypeStruct((N, 4, R, Wh), jnp.float32),
        grid=grid,
        in_specs=[
            pl.BlockSpec((kc, kc), lambda n, r: (0, 0)),            # constants
            pl.BlockSpec((None, tr, 2 * W), lambda n, r: (n, r, 0)),  # x rows
        ],
        out_specs=pl.BlockSpec((None, 4, tr, Wh), lambda n, r: (n, 0, r, 0)),
        compiler_params=pltpu.CompilerParams(
            dimension_semantics=("parallel", "parallel"),
            vmem_limit_bytes=vmem_limit,
        ),
        cost_estimate=pl.CostEstimate(
            flops=int(flops), transcendentals=0,
            bytes_accessed=int(bytes_accessed)),
    )(m, xv)

    # (N, 4, C*Hh, Wh) -> (N, 4C, Hh, Wh): free reshape; matches the
    # reshape/transpose/reshape (subband-major channels) of the torch module.
    return out5.reshape(N, 4 * C, Hh, Wh)


# ---------------------------------------------------------------------------
# Fallback: wrapper-side space-to-depth + tiled lane-dense VPU adds
# ---------------------------------------------------------------------------
def _haar_vpu_kernel(x_ref, o_ref):
    # x_ref / o_ref: (4, TL); x rows are (tl, tr, bl, br) of every 2x2 patch.
    tl = x_ref[0]
    tr = x_ref[1]
    bl = x_ref[2]
    br = x_ref[3]
    p = (tl + tr) * 0.25
    q = (tl - tr) * 0.25
    u = (bl + br) * 0.25
    v = (bl - br) * 0.25
    o_ref[0] = p + u
    o_ref[1] = q + v
    o_ref[2] = p - u
    o_ref[3] = q - v


def _pick_l_tile(L: int, target: int = 65536) -> int:
    if L <= target:
        return L
    t = target - (target % 128)
    while t >= 128:
        if L % t == 0:
            return t
        t -= 128
    return L


def _haar_tiled_vpu(x):
    N, C, H, W = x.shape
    Hh, Wh = H // 2, W // 2
    L = C * Hh * Wh

    xp = x.reshape(N, C, Hh, 2, Wh, 2)
    xp = jnp.transpose(xp, (0, 3, 5, 1, 2, 4)).reshape(N, 4, L)

    TL = _pick_l_tile(L)
    out = pl.pallas_call(
        _haar_vpu_kernel,
        out_shape=jax.ShapeDtypeStruct((N, 4, L), jnp.float32),
        grid=(N, L // TL),
        in_specs=[pl.BlockSpec((None, 4, TL), lambda n, l: (n, 0, l))],
        out_specs=pl.BlockSpec((None, 4, TL), lambda n, l: (n, 0, l)),
        compiler_params=pltpu.CompilerParams(
            dimension_semantics=("parallel", "parallel")),
        cost_estimate=pl.CostEstimate(
            flops=2 * N * 4 * L, transcendentals=0,
            bytes_accessed=2 * N * 4 * L * 4),
    )(xp)
    return out.reshape(N, 4 * C, Hh, Wh)


def haar_downsampling_fwd(x):
    """Forward HaarDownsampling (rev=False): (N, C, H, W) -> (N, 4C, H/2, W/2)."""
    try:
        return _haar_fused(x)
    except pltpu.LoweringException as e:      # pragma: no cover - safety net
        print("WARNING: fused Haar kernel failed to lower "
              f"({type(e).__name__}); using tiled VPU fallback.")
        return _haar_tiled_vpu(x)


# ---------------------------------------------------------------------------
# Pure-JAX reference replicating the PyTorch forward (grouped conv path)
# ---------------------------------------------------------------------------
def haar_downsampling_ref(x, haar_weights_full):
    N, C, H, W = x.shape
    out = jax.lax.conv_general_dilated(
        x,
        haar_weights_full,
        window_strides=(2, 2),
        padding="VALID",
        dimension_numbers=("NCHW", "OIHW", "NCHW"),
        feature_group_count=C,
        precision=jax.lax.Precision.HIGHEST,
    ) / 4.0
    out = out.reshape(N, C, 4, H // 2, W // 2)
    out = jnp.transpose(out, (0, 2, 1, 3, 4))
    return out.reshape(N, 4 * C, H // 2, W // 2)


if __name__ == "__main__":
    key = jax.random.PRNGKey(0)
    k0, k1 = jax.random.split(key)

    # Primary shape (matches the module spec's small-test convention).
    N, C, H, W = 2, 4, 16, 16
    x = jax.random.normal(k0, (N, C, H, W), dtype=jnp.float32)
    out = jax.block_until_ready(haar_downsampling_fwd(x))
    ref = jax.block_until_ready(haar_downsampling_ref(x, make_haar_weights(C)))
    assert out.shape == (N, 4 * C, H // 2, W // 2), out.shape
    np.testing.assert_allclose(np.asarray(out), np.asarray(ref),
                               rtol=1e-5, atol=1e-5)

    # Secondary shape exercising ragged row tiles and a non-power-of-two width.
    N2, C2, H2, W2 = 1, 2, 12, 20
    x2 = jax.random.normal(k1, (N2, C2, H2, W2), dtype=jnp.float32)
    out2 = jax.block_until_ready(haar_downsampling_fwd(x2))
    ref2 = jax.block_until_ready(
        haar_downsampling_ref(x2, make_haar_weights(C2)))
    assert out2.shape == (N2, 4 * C2, H2 // 2, W2 // 2), out2.shape
    np.testing.assert_allclose(np.asarray(out2), np.asarray(ref2),
                               rtol=1e-5, atol=1e-5)

    print("KERNEL_OK")
</pallas_src>

<mosaic_0001>
module attributes {stable_mosaic.version = 11 : i64} {
  func.func @_haar_fused_kernel(%arg0: i32, %arg1: i32, %arg2: memref<16x16xf32, #tpu.memory_space<vmem>>, %arg3: memref<1x8x32xf32, #tpu.memory_space<vmem>>, %arg4: memref<1x4x8x8xf32, #tpu.memory_space<vmem>>) attributes {dimension_semantics = [#tpu.dimension_semantics<parallel>, #tpu.dimension_semantics<parallel>], iteration_bounds = array<i64: 2, 4>, scalar_prefetch = 0 : i64, scratch_operands = 0 : i64, tpu.core_type = #tpu.core_type<tc>, window_params = [{pipeline_mode = #tpu.pipeline_mode<synchronous>, transform_indices = @transform_0, window_bounds = array<i64: 16, 16>}, {transform_indices = @transform_1, window_bounds = array<i64: 1, 8, 32>}, {transform_indices = @transform_2, window_bounds = array<i64: 1, 4, 8, 8>}]} {
    %c0 = arith.constant 0 : index
    %c0_0 = arith.constant 0 : index
    %c0_1 = arith.constant 0 : index
    %0 = vector.load %arg3[%c0, %c0_0, %c0_1] : memref<1x8x32xf32, #tpu.memory_space<vmem>>, vector<1x8x16xf32>
    %1 = vector.shape_cast %0 : vector<1x8x16xf32> to vector<8x16xf32>
    %c0_2 = arith.constant 0 : index
    %c0_3 = arith.constant 0 : index
    %c16 = arith.constant 16 : index
    %2 = vector.load %arg3[%c0_2, %c0_3, %c16] : memref<1x8x32xf32, #tpu.memory_space<vmem>>, vector<1x8x16xf32>
    %3 = vector.shape_cast %2 : vector<1x8x16xf32> to vector<8x16xf32>
    %4 = arith.addf %1, %3 : vector<8x16xf32>
    %5 = arith.subf %1, %3 : vector<8x16xf32>
    %c0_4 = arith.constant 0 : index
    %c0_5 = arith.constant 0 : index
    %6 = vector.load %arg2[%c0_4, %c0_5] : memref<16x16xf32, #tpu.memory_space<vmem>>, vector<16x16xf32>
    %cst = arith.constant dense<0.000000e+00> : vector<8x16xf32>
    %7 = tpu.matmul %4, %6, %cst {dimension_numbers = #tpu.dot_dimension_numbers<[1], [0], [0], [1], [0, 0, 1, 1], [], []>} : vector<8x16xf32>, vector<16x16xf32>, vector<8x16xf32> -> vector<8x16xf32>
    %cst_6 = arith.constant dense<0.000000e+00> : vector<8x16xf32>
    %8 = tpu.matmul %5, %6, %cst_6 {dimension_numbers = #tpu.dot_dimension_numbers<[1], [0], [0], [1], [0, 0, 1, 1], [], []>} : vector<8x16xf32>, vector<16x16xf32>, vector<8x16xf32> -> vector<8x16xf32>
    %9 = vector.extract_strided_slice %7 {offsets = [0, 0], sizes = [8, 8], strides = [1, 1]} : vector<8x16xf32> to vector<8x8xf32>
    %c0_7 = arith.constant 0 : index
    %c0_8 = arith.constant 0 : index
    %c0_9 = arith.constant 0 : index
    %c0_10 = arith.constant 0 : index
    %10 = vector.load %arg4[%c0_7, %c0_8, %c0_9, %c0_10] : memref<1x4x8x8xf32, #tpu.memory_space<vmem>>, vector<1x1x8x8xf32>
    %11 = vector.shape_cast %10 : vector<1x1x8x8xf32> to vector<8x8xf32>
    %12 = vector.shape_cast %9 : vector<8x8xf32> to vector<1x1x8x8xf32>
    tpu.vector_store %arg4[%c0_7, %c0_8, %c0_9, %c0_10], %12 {strides = array<i32>} : memref<1x4x8x8xf32, #tpu.memory_space<vmem>>, vector<1x1x8x8xf32>,
    %13 = vector.extract_strided_slice %7 {offsets = [0, 8], sizes = [8, 8], strides = [1, 1]} : vector<8x16xf32> to vector<8x8xf32>
    %c0_11 = arith.constant 0 : index
    %c1 = arith.constant 1 : index
    %c0_12 = arith.constant 0 : index
    %c0_13 = arith.constant 0 : index
    %14 = vector.load %arg4[%c0_11, %c1, %c0_12, %c0_13] : memref<1x4x8x8xf32, #tpu.memory_space<vmem>>, vector<1x1x8x8xf32>
    %15 = vector.shape_cast %14 : vector<1x1x8x8xf32> to vector<8x8xf32>
    %16 = vector.shape_cast %13 : vector<8x8xf32> to vector<1x1x8x8xf32>
    tpu.vector_store %arg4[%c0_11, %c1, %c0_12, %c0_13], %16 {strides = array<i32>} : memref<1x4x8x8xf32, #tpu.memory_space<vmem>>, vector<1x1x8x8xf32>,
    %17 = vector.extract_strided_slice %8 {offsets = [0, 0], sizes = [8, 8], strides = [1, 1]} : vector<8x16xf32> to vector<8x8xf32>
    %c0_14 = arith.constant 0 : index
    %c2 = arith.constant 2 : index
    %c0_15 = arith.constant 0 : index
    %c0_16 = arith.constant 0 : index
    %18 = vector.load %arg4[%c0_14, %c2, %c0_15, %c0_16] : memref<1x4x8x8xf32, #tpu.memory_space<vmem>>, vector<1x1x8x8xf32>
    %19 = vector.shape_cast %18 : vector<1x1x8x8xf32> to vector<8x8xf32>
    %20 = vector.shape_cast %17 : vector<8x8xf32> to vector<1x1x8x8xf32>
    tpu.vector_store %arg4[%c0_14, %c2, %c0_15, %c0_16], %20 {strides = array<i32>} : memref<1x4x8x8xf32, #tpu.memory_space<vmem>>, vector<1x1x8x8xf32>,
    %21 = vector.extract_strided_slice %8 {offsets = [0, 8], sizes = [8, 8], strides = [1, 1]} : vector<8x16xf32> to vector<8x8xf32>
    %c0_17 = arith.constant 0 : index
    %c3 = arith.constant 3 : index
    %c0_18 = arith.constant 0 : index
    %c0_19 = arith.constant 0 : index
    %22 = vector.load %arg4[%c0_17, %c3, %c0_18, %c0_19] : memref<1x4x8x8xf32, #tpu.memory_space<vmem>>, vector<1x1x8x8xf32>
    %23 = vector.shape_cast %22 : vector<1x1x8x8xf32> to vector<8x8xf32>
    %24 = vector.shape_cast %21 : vector<8x8xf32> to vector<1x1x8x8xf32>
    tpu.vector_store %arg4[%c0_17, %c3, %c0_18, %c0_19], %24 {strides = array<i32>} : memref<1x4x8x8xf32, #tpu.memory_space<vmem>>, vector<1x1x8x8xf32>,
    return
  }
  func.func @transform_0(%arg0: i32, %arg1: i32) -> (i32, i32) {
    %c0_i32 = arith.constant 0 : i32
    %c0_i32_0 = arith.constant 0 : i32
    %c0_i32_1 = arith.constant 0 : i32
    return %c0_i32, %c0_i32_0 : i32, i32
  }
  func.func @transform_1(%arg0: i32, %arg1: i32) -> (i32, i32, i32) {
    %c0_i32 = arith.constant 0 : i32
    %c0_i32_0 = arith.constant 0 : i32
    return %arg0, %arg1, %c0_i32 : i32, i32, i32
  }
  func.func @transform_2(%arg0: i32, %arg1: i32) -> (i32, i32, i32, i32) {
    %c0_i32 = arith.constant 0 : i32
    %c0_i32_0 = arith.constant 0 : i32
    %c0_i32_1 = arith.constant 0 : i32
    return %arg0, %c0_i32, %arg1, %c0_i32_0 : i32, i32, i32, i32
  }
}

</mosaic_0001>

<bundles_post_ra>
// kernel: tpu_custom_call.1
= control target key start
LH: loop header
LB: loop body
LE: loop exit
PB: predicated region body
PF: predicated region fallthrough
CT: control target
= control target key end

     0   :  { %s939_s0 = inlined_call_operand.hbm [shape: f32[16,16], index: 0, kind: input, shape index: {}]   ;;  %s940_s1 = inlined_call_operand.hbm [shape: f32[2,32,32], index: 1, kind: input, shape index: {}]   ;;  %s941_s2 = inlined_call_operand.vmem [shape: f32[2,4,32,8], index: 2, kind: output, shape index: {}]  }
   0x1   :  { %943 = sst [smem:[#allocation10_spill]] %s939_s0 }
   0x2   :  { %7 = vsyncpa [#allocation3], 0 }
   0x3   :  { %8 = vsyncpa [#allocation5], 0 }
   0x4   :  { %10 = vsyncpa [#allocation5 + $0x1], 0  ;;  %s784_s9 = smov 0   ;;  %s786_s10 = smov 0  }
   0x5   :  { %s788_s11 = smov 0   ;;  %s790_s12 = smov 0  }
   0x6   :  { %s792_s13 = smov 0   ;;  %s794_s14 = smov 0  }
   0x7   :  { %s796_s15 = smov 0   ;;  %s798_s16 = smov 0  }
   0x8 LB: > { %s505_s17 = sadd.s32 4294967295, %s759_s16   ;;  %p71_p0 = scmp.ne.s32.totalorder %s735_s10, %s731_s9  ;;  %s759_s16 = sphi %s798_s16, %s16_s16   ;;  %s755_s15 = sphi %s796_s15, %s960_s15   ;;  %s751_s14 = sphi %s794_s14, %s959_s14   ;;  %s747_s13 = sphi %s792_s13, %s958_s13   ;;  %s743_s12 = sphi %s790_s12, %s957_s12   ;;  %s739_s11 = sphi %s788_s11, %s956_s11   ;;  %s735_s10 = sphi %s786_s10, %s955_s10   ;;  %s731_s9 = sphi %s784_s9, %s954_s9  }
   0x9   : > { %p824_p1 = scmp.eq.s32.totalorder %s505_s17, 0  ;;  %p507_p2 = scmp.ge.s32.totalorder %s759_s16, 1 }
   0xa   : > { %p110_p3 = scmp.lt.s32.totalorder %s759_s16, 9  ;;  %s761_s21 = smov [#allocation2]  }
   0xb   : > { %p832_p4 = por %p824_p1, %p71_p0  ;;  %s122_s22 = sshll.u32 %s761_s21, 4  ;;  %s123_s22 = int_to_ptr.vmem [resolvable:$true] %s122_s22 }
   0xc   : > { %p836_p5 = pnand %p507_p2, %p110_p3  ;;  %s646_s23 = scalar_lea.vmem %s123_s22, 256 }
   0xd   : > { %p647_p9 = scmp.ne.s32.totalorder %s123_s22, %s646_s23  ;;  %p654_p12 = scmp.lt.s32.totalorder %s123_s22, %s123_s22 }
   0xe   : > { %p553_p6 = pneg %p836_p5  ;;  %p655_p13 = scmp.lt.s32.totalorder %s646_s23, %s646_s23 }
  0x10   : > { %p554_p7 = pnand %p553_p6, %p824_p1  ;;  %p656_p0 = por %p655_p13, %p654_p12 }
  0x12   : > { %p637_p8 = pneg %p554_p7 }
  0x14   : > { %p649_p10 = pnand %p647_p9, %p637_p8 }
  0x16   : > { %p650_p11 = pneg %p649_p10 }
  0x18   : > { %p657_p2 = pnand %p656_p0, %p650_p11 }
  0x1a   : > { %660 = shalt.err (!%p657_p2)
}
  0x1b   : > { %s762_s24 = smov 128   ;;  %s763_s25 = smov 8  }
  0x1c   : > { %s947_s0 = sld [smem:[#allocation10_spill]]  ;;  %p97_p3 = scmp.eq.s32.totalorder %s505_s17, 7 }
  0x1d   : > { %s25_s28 = sadd.s32 1, %s751_s14  ;;  %s28_s29 = sadd.s32 1, %s755_s15 }
  0x1e   : > { %p26_p6 = scmp.ge.s32.totalorder %s25_s28, 4  ;;  %p65_p8 = scmp.ne.s32.totalorder %s739_s11, %s735_s10 }
  0x1f   : > { %p66_p9 = scmp.eq.s32.totalorder %s759_s16, 0  ;;  %s58_s3 = sadd.s32 1, %s739_s11 }
  0x20   : > { %s962_s28 = smov (%p26_p6, %s25_s28), 0  ;;  %s964_s29 = smov (!%p26_p6, %s28_s29), %s755_s15 }
  0x21   : > { %948 = sst [smem:[#allocation9_spill]] %s962_s28  ;;  %s54_s30 = ssub.s32 %s751_s14, %s962_s28 }
  0x22   : > { %556 = dma.hbm_to_vmem [thread:$0]  (!%p554_p7), %s947_s0, 256, %s123_s22, [#allocation3], %s762_s24, %s762_s24, %s763_s25  }
  0x23   : > { %p30_p10 = scmp.ge.s32.totalorder %s964_s29, 2  ;;  %p858_p11 = por %p97_p3, %p65_p8 }
  0x24   : > { %p862_p7 = por %p66_p9, %p65_p8  ;;  %s136_s6 = sand.u32 1, %s739_s11  }
  0x25   : > { %s949_s4 = scalar_select %p858_p11, 1, 0 }
  0x26   : > { %s966_s29 = smov (%p30_p10, %s964_s29), 0  ;;  %p562_p12 = scmp.lt.s32.totalorder %s759_s16, 8 }
  0x27   : > { %s510_s7 = sshll.u32 %s136_s6, 3  ;;  %s53_s8 = ssub.s32 %s755_s15, %s966_s29 }
  0x28   : > { %s55_s9 = sor.u32 %s54_s30, %s53_s8  ;;  %s511_s17 = sshll.u32 %s755_s15, 2 }
  0x29   : > { %p56_p13 = scmp.eq.s32.totalorder %s55_s9, 0  ;;  %s145_s21 = sadd.s32 %s751_s14, %s511_s17 }
  0x2a   : > { %s512_s22 = sshll.u32 %s145_s21, 7  ;;  %s140_s23 = scalar_lea.vmem [#allocation4], %s510_s7 }
  0x2b   : > { %s149_s24 = sshll.u32 %s140_s23, 4  ;;  %s147_s0 = scalar_lea.hbm %s940_s1, %s512_s22  ;;  %s150_s24 = int_to_ptr.vmem [resolvable:$true] %s149_s24 }
  0x2c   : > { %s875_s25 = scalar_select %p56_p13, %s739_s11, %s58_s3  }
  0x2d   : > { %p884_p0 = pnand %p562_p12, %p862_p7  ;;  %s137_s30 = scalar_lea.sflag [#allocation5], %s136_s6 }
  0x2e   : > { %s674_s8 = scalar_lea.vmem %s150_s24, 128  ;;  %s764_s3 = smov [#allocation4]  }
  0x2f   : > { %p663_p2 = pneg %p884_p0  ;;  %p675_p3 = scmp.ne.s32.totalorder %s150_s24, %s674_s8 }
  0x30   : > { %s679_s7 = sshll.u32 %s764_s3, 4  ;;  %s680_s7 = int_to_ptr.vmem [resolvable:$false] %s679_s7 }
  0x31   : > { %p677_p6 = pnand %p675_p3, %p663_p2  ;;  %s681_s9 = scalar_lea.vmem %s680_s7, 256 }
  0x32   : > { %p682_p9 = scmp.lt.s32.totalorder %s150_s24, %s680_s7  ;;  %p683_p10 = scmp.lt.s32.totalorder %s681_s9, %s674_s8 }
  0x33   : > { %p678_p8 = pneg %p677_p6 }
  0x34   : > { %p684_p13 = por %p683_p10, %p682_p9 }
  0x36   : > { %p685_p11 = pnand %p684_p13, %p678_p8 }
  0x38   : > { %688 = shalt.err (!%p685_p11)
}
  0x39   : > { %560 = dma.hbm_to_vmem [thread:$0]  (!%p884_p0), %s147_s0, 128, %s150_s24, %s137_s30  }
  0x3a   : > { %158 = sbr.rel (%p836_p5) target bundleno = 505 (0x1f9), region = 28 }
  0x3f   : > { %722 = dma.done.wait (%p824_p1), [#allocation3], 256  }
  0x40   : > { %724 = vsyncadd (%p824_p1), [#allocation3], 4294967040  ;;  %s899_s5 = sand.u32 1, %s735_s10  }
  0x41   : > { %s515_s6 = sshll.u32 %s899_s5, 3  ;;  %s165_s17 = scalar_lea.sflag [#allocation5], %s899_s5 }
  0x42   : > { %s168_s21 = scalar_lea.vmem [#allocation4], %s515_s6 }
  0x43   : > { %726 = dma.done.wait (%p832_p4), %s165_s17, 128  }
  0x44   : > { %728 = vsyncadd (%p832_p4), %s165_s17, 4294967168  ;;  %v765_v0 = vmov 0.0   ;;  %vm766_vm0 = vmmov 0   ;;  %v188_v1 = vld [vmem:[%s168_s21] sm:$0xff]  ;;  %v196_v2 = vld [vmem:[#allocation2 + $0x8] sm:$0xff]  ;;  %s767_s0 = smov 112  }
  0x45   : > { %533 = vmatprep.subr.mxu0 %v765_v0  ;;  %540 = vmatprep.subr.mxu1 %v765_v0  ;;  %v195_v3 = vld [vmem:[#allocation2] sm:$0xff]  ;;  %vm197_vm1 = vcmask 130048   ;;  %s516_s18 = sshll.u32 %s899_s5, 5  ;;  %vm344_vm2 = vcmask 64512   ;;  %s768_s20 = smov 120  }
  0x46   : > { %537 = vmatprep.mubr.msk.f32.mxu0 %vm766_vm0, %v765_v0  ;;  %544 = vmatprep.mubr.msk.f32.mxu1 %vm766_vm0, %v765_v0  ;;  %s187_s19 = scalar_lea.vmem [#allocation6], %s516_s18  ;;  %p952_p1 = scmp.ne.s32.totalorder %s949_s4, 0 }
  0x47   : > { %190 = vrot.lane.b32.xlu0 %v188_v1, %s767_s0  ;;  %534 = vmatpush3.msra.mxu0 %v196_v2  ;;  %s523_s28 = sshll.u32 (%p952_p1), %s747_s13, 4 }
  0x48   : > { %541 = vmatpush3.msra.mxu1 %v196_v2  ;;  %535 = vmatprep.subr.mxu0 %v765_v0  ;;  %s368_s22 = sadd.s32 (%p952_p1), %s743_s12, %s523_s28 }
  0x49   : > { %542 = vmatprep.subr.mxu1 %v765_v0  ;;  %536 = vmatpush3.msra.mxu0 %v195_v3  ;;  %s524_s23 = sshll.u32 (%p952_p1), %s368_s22, 3 }
  0x4a   : > { %543 = vmatpush3.msra.mxu1 %v195_v3  ;;  %s370_s27 = scalar_lea.vmem (%p952_p1), %s941_s2, %s524_s23 }
  0xb9   : > { %v191_v4 = vpop.permute.xlu0 %190 }
  0xba   : > { %v193_v5 = vadd.f32 %v191_v4, %v188_v1  ;;  %v194_v6 = vsub.f32 %v188_v1, %v191_v4 }
  0xbc   : > { %538 = vmatmul.mubr.msk.f32.vlgmr.msra.gmra.mxu0 %vm197_vm1, %v193_v5  ;;  %545 = vmatmul.mubr.msk.f32.vlgmr.msra.gmra.mxu1 %vm197_vm1, %v194_v6 }
 0x17c   : > { %v267_v7 = vpop.f32.mrf.mxu0  ;;  %v340_v8 = vpop.f32.mrf.mxu1 }
 0x17d   : > { %345 = vst.msk [vmem:[%s187_s19] sm:$0xff] %vm344_vm2, %v267_v7  ;;  %520 = vst.msk [vmem:[%s187_s19 + $0x10] sm:$0xff] %vm344_vm2, %v340_v8  ;;  %347 = vrot.lane.b32.xlu0 %v267_v7, %s768_s20  ;;  %355 = vrot.lane.b32.xlu1 %v340_v8, %s768_s20 }
 0x17e   : > { %v539_v9 = vpop.f32.mrf.mxu0  ;;  %v546_v10 = vpop.f32.mrf.mxu1 }
 0x184   : > { %v405_v13 = vld [vmem:[%s187_s19] sm:$0xff] (%p952_p1)  ;;  %v409_v15 = vld [vmem:[%s187_s19 + $0x10] sm:$0xff] (%p952_p1) }
 0x185   : > { %406 = vst [vmem:[%s370_s27] sm:$0xff] (%p952_p1), %v405_v13  ;;  %410 = vst [vmem:[%s370_s27 + $0x40] sm:$0xff] (%p952_p1), %v409_v15 }
 0x1ec   : > { %366 = sbr.rel (!%p952_p1) target bundleno = 505 (0x1f9), region = 40 }
 0x1ef   : > { %v348_v11 = vpop.permute.xlu0 %347  ;;  %v356_v12 = vpop.permute.xlu1 %355 }
 0x1f0   : > { %519 = vst.msk [vmem:[%s187_s19 + $0x8] sm:$0xff] %vm344_vm2, %v348_v11  ;;  %521 = vst.msk [vmem:[%s187_s19 + $0x18] sm:$0xff] %vm344_vm2, %v356_v12 }
 0x1f7   : > { %v407_v14 = vld [vmem:[%s187_s19 + $0x8] sm:$0xff]  ;;  %v411_v16 = vld [vmem:[%s187_s19 + $0x18] sm:$0xff] }
 0x1f8   : > { %408 = vst [vmem:[%s370_s27 + $0x20] sm:$0xff] %v407_v14  ;;  %412 = vst [vmem:[%s370_s27 + $0x60] sm:$0xff] %v411_v16 }
 0x1f9 PF: > { %s16_s16 = sadd.s32 1, %s759_s16   ;;  %s953_s4 = sld [smem:[#allocation9_spill]] }
 0x1fa   : > { %p13_p4 = scmp.ge.s32.totalorder %s16_s16, 10   ;;  %s954_s9 = smov %s735_s10 }
 0x1fb   : > { %s955_s10 = smov %s739_s11  ;;  %s956_s11 = smov %s875_s25 }
 0x1fc   : > { %s957_s12 = smov %s751_s14  ;;  %s958_s13 = smov %s755_s15 }
 0x1fd   : > { %s960_s15 = smov %s966_s29  ;;  %15 = sbr.rel (!%p13_p4) target bundleno = 8 (0x8), region = 114 }
 0x1ff   : > { %s959_s14 = smov %s953_s4 }
 0x202   :  { %428 = vsyncpa [#allocation3], 1 }
 0x203   :  { %430 = vsyncpa [#allocation3 + $0x1], 1 }
 0x204   :  { %431 = vsyncpa [#allocation5], 1 }
 0x205   :  { %433 = vsyncpa [#allocation5 + $0x1], 1 }

</bundles_post_ra>
